<compile_context>
chip_gen: v7x
topology: tpu7x:2x2x1
jax: 0.10.0
libtpu: 0.0.40
codegen_flags: <defaults>
</compile_context>

<pallas_src>
import numpy as np
import jax
import jax.numpy as jnp
from jax.experimental import pallas as pl
from jax.experimental.pallas import tpu as pltpu


def _identity_kernel(x_ref, o_ref):
    # One lane-dense tile copy: VMEM load -> VMEM store.  BlockSpec machinery
    # pipelines the HBM DMAs (prefetch of step i+1 / writeback of step i-1
    # overlap with this copy), so the kernel runs at the memory roofline.
    o_ref[...] = x_ref[...]


def _sublane_multiple(itemsize: int) -> int:
    # Sub-32-bit dtypes pack along sublanes: keep row blocks full packed rows.
    return {4: 8, 2: 16, 1: 32}.get(itemsize, 8)


def hook_point_forward(x, *, tile_budget_bytes=2 * 1024 * 1024, use_kernel=True):
    """Identity forward (HookPoint).

    x: any-rank array.  With use_kernel=False this is a true no-op (the
    recommended production path for an identity).  With use_kernel=True a
    bandwidth-roofline Pallas copy kernel is emitted.

    tile_budget_bytes bounds a single tile; with double-buffered input +
    output that is ~4x in VMEM, so the 2 MiB default stays inside the 16 MiB
    scoped-VMEM default of v5e and well under v6e / v7x limits.
    """
    if not use_kernel:
        return x  # fastest "kernel": no HBM traffic at all

    if x.ndim == 0 or x.size == 0:
        return x  # nothing to copy; avoid degenerate zero-step grids

    orig_shape = x.shape
    x2 = x.reshape(1, -1) if x.ndim == 1 else x.reshape(-1, x.shape[-1])
    R, C = x2.shape
    itemsize = jnp.dtype(x2.dtype).itemsize
    sub = _sublane_multiple(itemsize)

    # --- Column tiling: full extent when one row fits the budget, else the
    # largest multiple of 128 lanes under the budget (keeps vst unmasked).
    if C * itemsize <= tile_budget_bytes:
        tc = C  # full-extent last dim is always layout-legal
    else:
        tc = max(128, (tile_budget_bytes // itemsize) // 128 * 128)

    # --- Row tiling: as many sublane-multiple rows as fit the budget.
    rows_by_budget = max(sub, (tile_budget_bytes // max(1, tc * itemsize)) // sub * sub)
    if R <= rows_by_budget:
        tr = R  # single full-extent row block (legal even if not a multiple of sub)
    else:
        tr = rows_by_budget  # multiple of sub; ragged tail handled by cdiv grid

    grid = (pl.cdiv(R, tr), pl.cdiv(C, tc))

    out = pl.pallas_call(
        _identity_kernel,
        out_shape=jax.ShapeDtypeStruct((R, C), x2.dtype),
        grid=grid,
        in_specs=[pl.BlockSpec((tr, tc), lambda i, j: (i, j))],
        out_specs=pl.BlockSpec((tr, tc), lambda i, j: (i, j)),
        # Output HBM buffer aliases the input buffer: halves allocation
        # pressure and lets XLA shortcut the round-trip where possible.
        input_output_aliases={0: 0},
        compiler_params=pltpu.CompilerParams(
            # Both axes are embarrassingly parallel; on v7x this shards the
            # grid across the 2 TensorCores, on v5e/v6e it is neutral.
            dimension_semantics=("parallel", "parallel"),
        ),
        cost_estimate=pl.CostEstimate(
            flops=0,
            transcendentals=0,
            bytes_accessed=2 * R * C * itemsize,
        ),
    )(x2)
    return out.reshape(orig_shape)


if __name__ == "__main__":
    key = jax.random.PRNGKey(0)

    # HookPoint has no parameters; forward(x) == x for any shape.
    x = jax.random.normal(key, (8, 32), dtype=jnp.float32)  # (seq=8, hidden=32)
    x_host = np.asarray(x)
    y = hook_point_forward(x)
    jax.block_until_ready(y)
    assert y.shape == x.shape and y.dtype == x.dtype
    assert np.array_equal(np.asarray(y), x_host)

    # Exercise the dtype-aware / ragged-row path at a small bf16 shape.
    xb = jax.random.normal(key, (13, 256), dtype=jnp.bfloat16)
    xb_host = np.asarray(xb)
    yb = hook_point_forward(xb)
    jax.block_until_ready(yb)
    assert yb.shape == xb.shape and yb.dtype == xb.dtype
    assert np.array_equal(np.asarray(yb), xb_host)

    # Higher-rank input collapses to (rows, hidden) internally and restores shape.
    x4 = jax.random.normal(key, (2, 4, 16, 16), dtype=jnp.float32)
    x4_host = np.asarray(x4)
    y4 = hook_point_forward(x4)
    jax.block_until_ready(y4)
    assert y4.shape == x4.shape and y4.dtype == x4.dtype
    assert np.array_equal(np.asarray(y4), x4_host)

    # The recommended production path for an identity: no kernel at all.
    y_fast = hook_point_forward(x, use_kernel=False)
    assert y_fast is x

    print("KERNEL_OK")
</pallas_src>

<mosaic_0001>
module attributes {stable_mosaic.version = 11 : i64} {
  func.func @_identity_kernel(%arg0: i32, %arg1: i32, %arg2: memref<8x32xf32, #tpu.memory_space<vmem>>, %arg3: memref<8x32xf32, #tpu.memory_space<vmem>>) attributes {dimension_semantics = [#tpu.dimension_semantics<parallel>, #tpu.dimension_semantics<parallel>], iteration_bounds = array<i64: 1, 1>, scalar_prefetch = 0 : i64, scratch_operands = 0 : i64, tpu.core_type = #tpu.core_type<tc>, window_params = [{transform_indices = @transform_0, window_bounds = array<i64: 8, 32>}, {transform_indices = @transform_1, window_bounds = array<i64: 8, 32>}]} {
    %c0 = arith.constant 0 : index
    %c0_0 = arith.constant 0 : index
    %0 = vector.load %arg2[%c0, %c0_0] : memref<8x32xf32, #tpu.memory_space<vmem>>, vector<8x32xf32>
    %c0_1 = arith.constant 0 : index
    %c0_2 = arith.constant 0 : index
    %1 = vector.load %arg3[%c0_1, %c0_2] : memref<8x32xf32, #tpu.memory_space<vmem>>, vector<8x32xf32>
    tpu.vector_store %arg3[%c0_1, %c0_2], %0 {strides = array<i32>} : memref<8x32xf32, #tpu.memory_space<vmem>>, vector<8x32xf32>,
    return
  }
  func.func @transform_0(%arg0: i32, %arg1: i32) -> (i32, i32) {
    %c0_i32 = arith.constant 0 : i32
    return %arg0, %arg1 : i32, i32
  }
  func.func @transform_1(%arg0: i32, %arg1: i32) -> (i32, i32) {
    %c0_i32 = arith.constant 0 : i32
    return %arg0, %arg1 : i32, i32
  }
}

</mosaic_0001>

<bundles_post_ra>
// kernel: tpu_custom_call.1
= control target key start
LH: loop header
LB: loop body
LE: loop exit
PB: predicated region body
PF: predicated region fallthrough
CT: control target
= control target key end

     0   :  { %6 = vsyncpa [#allocation3], 0  ;;  %s125_s0 = inlined_call_operand.hbm [shape: f32[8,32], index: 0, kind: input, shape index: {}, may-alias: {0,1}]   ;;  %s126_s1 = inlined_call_operand.hbm [shape: f32[8,32], index: 1, kind: output, shape index: {}, may-alias: {0,1}]  }
   0x1   :  { %7 = vsyncpa [#allocation4], 0  ;;  %s89_s6 = smov [#allocation2]   ;;  %s41_s10 = scalar_lea.hbm %s125_s0, 128 }
   0x2   :  { %s14_s7 = sshll.u32 %s89_s6, 4  ;;  %p42_p0 = scmp.ne.s32.totalorder %s125_s0, %s41_s10  ;;  %s15_s7 = int_to_ptr.vmem [resolvable:$true] %s14_s7 }
   0x3   :  { %p45_p1 = scmp.lt.u32.totalorder %s41_s10, %s125_s0 }
   0x5   :  { %p47_p2 = pnand %p45_p1, %p42_p0 }
   0x7   :  { %50 = shalt.err (!%p47_p2)
}
   0x8   :  { %s51_s15 = scalar_lea.vmem %s15_s7, 128  ;;  %p56_p4 = scmp.lt.s32.totalorder %s15_s7, %s15_s7 }
   0x9   :  { %p52_p3 = scmp.ne.s32.totalorder %s15_s7, %s51_s15  ;;  %p57_p5 = scmp.lt.s32.totalorder %s51_s15, %s51_s15 }
   0xb   :  { %p58_p6 = por %p57_p5, %p56_p4 }
   0xd   :  { %p59_p7 = pnand %p58_p6, %p52_p3 }
   0xf   :  { %62 = shalt.err (!%p59_p7)
}
  0x10   :  { %17 = dma.hbm_to_vmem [thread:$0]  %s125_s0, 128, %s15_s7, [#allocation3]  }
  0x11   :  { %85 = dma.done.wait [#allocation3], 128  }
  0x12   :  { %86 = vsyncadd [#allocation3], 4294967168  ;;  %s90_s18 = smov [#allocation5]   ;;  %vm22_vm0 = vcmask 261120   ;;  %v21_v0 = vld [vmem:[#allocation2] sm:$0xff] }
  0x13   :  { %s30_s19 = sshll.u32 %s90_s18, 4  ;;  %23 = vst.msk [vmem:[#allocation5] sm:$0xff] %vm22_vm0, %v21_v0  ;;  %s31_s19 = int_to_ptr.vmem [resolvable:$true] %s30_s19 }
  0x14   :  { %s63_s20 = scalar_lea.vmem %s31_s19, 128  ;;  %p68_p9 = scmp.lt.s32.totalorder %s31_s19, %s31_s19 }
  0x15   :  { %p64_p8 = scmp.ne.s32.totalorder %s31_s19, %s63_s20  ;;  %p69_p10 = scmp.lt.s32.totalorder %s63_s20, %s63_s20 }
  0x17   :  { %p70_p11 = por %p69_p10, %p68_p9 }
  0x19   :  { %p71_p12 = pnand %p70_p11, %p64_p8 }
  0x1b   :  { %74 = shalt.err (!%p71_p12)
}
  0x1c   :  { %s75_s23 = scalar_lea.hbm %s126_s1, 128 }
  0x1d   :  { %p76_p13 = scmp.ne.s32.totalorder %s126_s1, %s75_s23  ;;  %p79_p0 = scmp.lt.u32.totalorder %s75_s23, %s126_s1 }
  0x1f   :  { %p81_p1 = pnand %p79_p0, %p76_p13 }
  0x21   :  { %84 = shalt.err (!%p81_p1)
}
  0x22   :  { %33 = dma.vmem_to_hbm [thread:$0]  %s31_s19, 128, %s126_s1, [#allocation4]  }
  0x23   :  { %87 = dma.done.wait [#allocation4], 128  }
  0x24   :  { %88 = vsyncadd [#allocation4], 4294967168 }
  0x25   :  { %37 = vsyncpa [#allocation3], 1 }
  0x26   :  { %38 = vsyncpa [#allocation4], 1 }

</bundles_post_ra>
